<compile_context>
chip_gen: v7x
topology: tpu7x:2x2x1
jax: 0.10.0
libtpu: 0.0.40
codegen_flags: <defaults>
</compile_context>

<pallas_src>
import math

import jax
import jax.numpy as jnp
from jax.experimental import pallas as pl
from jax.experimental.pallas import tpu as pltpu

HIDDEN_DIM = 32
HALF_DIM = HIDDEN_DIM // 2
H4 = HIDDEN_DIM * 4            # 128 -> already lane-dense intermediate
OUT_PAD = 128                  # final out-features padded to a full lane width
BATCH = 8


def _time_encoder_kernel(x_ref, freq_ref, phase_ref, w1_ref, b1_ref,
                         w2_ref, b2_ref, o_ref):
    # --- SinusoidalPosEmb (fused sin/cos: cos(y) == sin(y + pi/2)) --------
    x = x_ref[...]                                      # (BB, 1) f32
    emb = jnp.sin(x * freq_ref[...] + phase_ref[...])   # (BB, HIDDEN_DIM)

    # --- Linear(hidden, 4*hidden) -----------------------------------------
    h = jnp.dot(emb, w1_ref[...], preferred_element_type=jnp.float32)
    h = h + b1_ref[...]                                  # (BB, H4)

    # --- Mish: h * tanh(softplus(h)) via t = exp(h) ------------------------
    # tanh(log(1+t)) = (t^2 + 2t) / (t^2 + 2t + 2); clamp exp input and guard
    # large h (mish(h) -> h) so no inf/NaN can appear.
    hc = jnp.minimum(h, 20.0)
    t = jnp.exp(hc)
    u = t * (t + 2.0)
    mish = h * (u / (u + 2.0))
    h = jnp.where(h > 20.0, h, mish)

    # --- Linear(4*hidden, hidden padded to 128) -----------------------------
    out = jnp.dot(h, w2_ref[...], preferred_element_type=jnp.float32)
    o_ref[...] = out + b2_ref[...]                       # (BB, OUT_PAD)


def time_encoder(x, w1, b1, w2, b2, *, block_b=256):
    """x: (B,) f32 time scalars -> (B, HIDDEN_DIM) f32.

    w1: (HIDDEN_DIM, 4*HIDDEN_DIM), w2: (4*HIDDEN_DIM, HIDDEN_DIM)
    (weights stored transposed vs. PyTorch so the hot path is emb @ W + b).
    """
    B = x.shape[0]
    x2d = x.reshape(B, 1).astype(jnp.float32)

    # Batch padding / blocking (pad to sublane multiple, block across grid).
    pb = ((B + 7) // 8) * 8
    bb = min(block_b, pb)
    pb = ((pb + bb - 1) // bb) * bb
    if pb != B:
        x2d = jnp.pad(x2d, ((0, pb - B), (0, 0)))
    grid = (pb // bb,)

    # Constant frequency / phase tables for the fused sinusoidal embedding.
    scale = math.log(10000.0) / (HALF_DIM - 1)
    freq = jnp.exp(jnp.arange(HALF_DIM, dtype=jnp.float32) * (-scale))
    freq32 = jnp.concatenate([freq, freq]).reshape(1, HIDDEN_DIM)
    phase32 = jnp.concatenate([
        jnp.zeros((HALF_DIM,), jnp.float32),
        jnp.full((HALF_DIM,), 0.5 * math.pi, jnp.float32),
    ]).reshape(1, HIDDEN_DIM)

    # Lane-dense output: zero-pad w2/b2 out-features to 128.
    w2p = jnp.pad(w2.astype(jnp.float32), ((0, 0), (0, OUT_PAD - HIDDEN_DIM)))
    b2p = jnp.pad(b2.astype(jnp.float32),
                  (0, OUT_PAD - HIDDEN_DIM)).reshape(1, OUT_PAD)
    b1_2d = b1.reshape(1, H4).astype(jnp.float32)
    w1f = w1.astype(jnp.float32)

    cost = pl.CostEstimate(
        flops=2 * pb * HIDDEN_DIM * H4 + 2 * pb * H4 * OUT_PAD + 8 * pb * H4,
        transcendentals=pb * (HIDDEN_DIM + H4),          # sin + exp
        bytes_accessed=4 * (pb + 2 * HIDDEN_DIM + HIDDEN_DIM * H4 + H4
                            + H4 * OUT_PAD + OUT_PAD + pb * OUT_PAD),
    )

    out_padded = pl.pallas_call(
        _time_encoder_kernel,
        out_shape=jax.ShapeDtypeStruct((pb, OUT_PAD), jnp.float32),
        grid=grid,
        in_specs=[
            pl.BlockSpec((bb, 1), lambda i: (i, 0)),            # x
            pl.BlockSpec((1, HIDDEN_DIM), lambda i: (0, 0)),    # freq32
            pl.BlockSpec((1, HIDDEN_DIM), lambda i: (0, 0)),    # phase32
            pl.BlockSpec((HIDDEN_DIM, H4), lambda i: (0, 0)),   # w1
            pl.BlockSpec((1, H4), lambda i: (0, 0)),            # b1
            pl.BlockSpec((H4, OUT_PAD), lambda i: (0, 0)),      # w2 (padded)
            pl.BlockSpec((1, OUT_PAD), lambda i: (0, 0)),       # b2 (padded)
        ],
        out_specs=pl.BlockSpec((bb, OUT_PAD), lambda i: (i, 0)),
        compiler_params=pltpu.CompilerParams(
            dimension_semantics=("parallel",)),
        cost_estimate=cost,
    )(x2d, freq32, phase32, w1f, b1_2d, w2p, b2p)

    return out_padded[:B, :HIDDEN_DIM]


def _init_linear(key, fan_in, fan_out):
    """Deterministic init mimicking nn.Linear (uniform +/- 1/sqrt(fan_in)).
    Weight stored (in_features, out_features)."""
    kw, kb = jax.random.split(key)
    bound = 1.0 / math.sqrt(fan_in)
    w = jax.random.uniform(kw, (fan_in, fan_out), jnp.float32, -bound, bound)
    b = jax.random.uniform(kb, (fan_out,), jnp.float32, -bound, bound)
    return w, b


def _reference(x, w1, b1, w2, b2):
    """Pure-JAX reference matching the PyTorch forward."""
    half = HIDDEN_DIM // 2
    scale = math.log(10000.0) / (half - 1)
    freq = jnp.exp(jnp.arange(half, dtype=jnp.float32) * (-scale))
    arg = x[:, None] * freq[None, :]
    emb = jnp.concatenate([jnp.sin(arg), jnp.cos(arg)], axis=-1)
    h = emb @ w1 + b1
    h = h * jnp.tanh(jax.nn.softplus(h))  # Mish
    return h @ w2 + b2


if __name__ == "__main__":
    key = jax.random.PRNGKey(0)
    k_x, k_l1, k_l2 = jax.random.split(key, 3)

    # Diffusion timesteps (continuous), small batch.
    x = jax.random.uniform(k_x, (BATCH,), jnp.float32, 0.0, 10.0)

    w1, b1 = _init_linear(k_l1, HIDDEN_DIM, HIDDEN_DIM * 4)
    w2, b2 = _init_linear(k_l2, HIDDEN_DIM * 4, HIDDEN_DIM)

    out = time_encoder(x, w1, b1, w2, b2)
    out = jax.block_until_ready(out)

    ref = _reference(x, w1, b1, w2, b2)
    assert out.shape == (BATCH, HIDDEN_DIM), out.shape
    assert jnp.allclose(out, ref, atol=5e-5, rtol=1e-4), "mismatch vs reference"

    print("KERNEL_OK")
</pallas_src>

<mosaic_0001>
module attributes {stable_mosaic.version = 11 : i64} {
  func.func @_time_encoder_kernel(%arg0: i32, %arg1: memref<8x1xf32, #tpu.memory_space<vmem>>, %arg2: memref<1x32xf32, #tpu.memory_space<vmem>>, %arg3: memref<1x32xf32, #tpu.memory_space<vmem>>, %arg4: memref<32x128xf32, #tpu.memory_space<vmem>>, %arg5: memref<1x128xf32, #tpu.memory_space<vmem>>, %arg6: memref<128x128xf32, #tpu.memory_space<vmem>>, %arg7: memref<1x128xf32, #tpu.memory_space<vmem>>, %arg8: memref<8x128xf32, #tpu.memory_space<vmem>>) attributes {dimension_semantics = [#tpu.dimension_semantics<parallel>], iteration_bounds = array<i64: 1>, scalar_prefetch = 0 : i64, scratch_operands = 0 : i64, tpu.core_type = #tpu.core_type<tc>, window_params = [{transform_indices = @transform_0, window_bounds = array<i64: 8, 1>}, {pipeline_mode = #tpu.pipeline_mode<synchronous>, transform_indices = @transform_1, window_bounds = array<i64: 1, 32>}, {pipeline_mode = #tpu.pipeline_mode<synchronous>, transform_indices = @transform_2, window_bounds = array<i64: 1, 32>}, {pipeline_mode = #tpu.pipeline_mode<synchronous>, transform_indices = @transform_3, window_bounds = array<i64: 32, 128>}, {pipeline_mode = #tpu.pipeline_mode<synchronous>, transform_indices = @transform_4, window_bounds = array<i64: 1, 128>}, {pipeline_mode = #tpu.pipeline_mode<synchronous>, transform_indices = @transform_5, window_bounds = array<i64: 128, 128>}, {pipeline_mode = #tpu.pipeline_mode<synchronous>, transform_indices = @transform_6, window_bounds = array<i64: 1, 128>}, {transform_indices = @transform_7, window_bounds = array<i64: 8, 128>}]} {
    %c0 = arith.constant 0 : index
    %c0_0 = arith.constant 0 : index
    %0 = vector.load %arg1[%c0, %c0_0] : memref<8x1xf32, #tpu.memory_space<vmem>>, vector<8x1xf32>
    %c0_1 = arith.constant 0 : index
    %c0_2 = arith.constant 0 : index
    %1 = vector.load %arg2[%c0_1, %c0_2] : memref<1x32xf32, #tpu.memory_space<vmem>>, vector<1x32xf32>
    %2 = vector.broadcast %0 : vector<8x1xf32> to vector<8x32xf32>
    %3 = vector.broadcast %1 : vector<1x32xf32> to vector<8x32xf32>
    %4 = arith.mulf %2, %3 : vector<8x32xf32>
    %c0_3 = arith.constant 0 : index
    %c0_4 = arith.constant 0 : index
    %5 = vector.load %arg3[%c0_3, %c0_4] : memref<1x32xf32, #tpu.memory_space<vmem>>, vector<1x32xf32>
    %6 = vector.broadcast %5 : vector<1x32xf32> to vector<8x32xf32>
    %7 = arith.addf %4, %6 : vector<8x32xf32>
    %8 = math.sin %7 : vector<8x32xf32>
    %c0_5 = arith.constant 0 : index
    %c0_6 = arith.constant 0 : index
    %9 = vector.load %arg4[%c0_5, %c0_6] : memref<32x128xf32, #tpu.memory_space<vmem>>, vector<32x128xf32>
    %cst = arith.constant dense<0.000000e+00> : vector<8x128xf32>
    %10 = tpu.matmul %8, %9, %cst {dimension_numbers = #tpu.dot_dimension_numbers<[1], [0], [0], [1], [0, 0, 1, 1], [], []>} : vector<8x32xf32>, vector<32x128xf32>, vector<8x128xf32> -> vector<8x128xf32>
    %c0_7 = arith.constant 0 : index
    %c0_8 = arith.constant 0 : index
    %11 = vector.load %arg5[%c0_7, %c0_8] : memref<1x128xf32, #tpu.memory_space<vmem>>, vector<1x128xf32>
    %12 = vector.broadcast %11 : vector<1x128xf32> to vector<8x128xf32>
    %13 = arith.addf %10, %12 : vector<8x128xf32>
    %cst_9 = arith.constant 2.000000e+01 : f32
    %14 = vector.broadcast %cst_9 : f32 to vector<8x128xf32>
    %15 = arith.minimumf %13, %14 : vector<8x128xf32>
    %16 = math.exp %15 : vector<8x128xf32>
    %cst_10 = arith.constant 2.000000e+00 : f32
    %17 = vector.broadcast %cst_10 : f32 to vector<8x128xf32>
    %18 = arith.addf %16, %17 : vector<8x128xf32>
    %19 = arith.mulf %16, %18 : vector<8x128xf32>
    %cst_11 = arith.constant 2.000000e+00 : f32
    %20 = vector.broadcast %cst_11 : f32 to vector<8x128xf32>
    %21 = arith.addf %19, %20 : vector<8x128xf32>
    %22 = arith.divf %19, %21 : vector<8x128xf32>
    %23 = arith.mulf %13, %22 : vector<8x128xf32>
    %cst_12 = arith.constant 2.000000e+01 : f32
    %24 = vector.broadcast %cst_12 : f32 to vector<8x128xf32>
    %25 = arith.cmpf ogt, %13, %24 : vector<8x128xf32>
    %26 = arith.select %25, %13, %23 : vector<8x128xi1>, vector<8x128xf32>
    %c0_13 = arith.constant 0 : index
    %c0_14 = arith.constant 0 : index
    %27 = vector.load %arg6[%c0_13, %c0_14] : memref<128x128xf32, #tpu.memory_space<vmem>>, vector<128x128xf32>
    %cst_15 = arith.constant dense<0.000000e+00> : vector<8x128xf32>
    %28 = tpu.matmul %26, %27, %cst_15 {dimension_numbers = #tpu.dot_dimension_numbers<[1], [0], [0], [1], [0, 0, 1, 1], [], []>} : vector<8x128xf32>, vector<128x128xf32>, vector<8x128xf32> -> vector<8x128xf32>
    %c0_16 = arith.constant 0 : index
    %c0_17 = arith.constant 0 : index
    %29 = vector.load %arg7[%c0_16, %c0_17] : memref<1x128xf32, #tpu.memory_space<vmem>>, vector<1x128xf32>
    %30 = vector.broadcast %29 : vector<1x128xf32> to vector<8x128xf32>
    %31 = arith.addf %28, %30 : vector<8x128xf32>
    %c0_18 = arith.constant 0 : index
    %c0_19 = arith.constant 0 : index
    %32 = vector.load %arg8[%c0_18, %c0_19] : memref<8x128xf32, #tpu.memory_space<vmem>>, vector<8x128xf32>
    tpu.vector_store %arg8[%c0_18, %c0_19], %31 {strides = array<i32>} : memref<8x128xf32, #tpu.memory_space<vmem>>, vector<8x128xf32>,
    return
  }
  func.func @transform_0(%arg0: i32) -> (i32, i32) {
    %c0_i32 = arith.constant 0 : i32
    %c0_i32_0 = arith.constant 0 : i32
    return %arg0, %c0_i32 : i32, i32
  }
  func.func @transform_1(%arg0: i32) -> (i32, i32) {
    %c0_i32 = arith.constant 0 : i32
    %c0_i32_0 = arith.constant 0 : i32
    %c0_i32_1 = arith.constant 0 : i32
    return %c0_i32, %c0_i32_0 : i32, i32
  }
  func.func @transform_2(%arg0: i32) -> (i32, i32) {
    %c0_i32 = arith.constant 0 : i32
    %c0_i32_0 = arith.constant 0 : i32
    %c0_i32_1 = arith.constant 0 : i32
    return %c0_i32, %c0_i32_0 : i32, i32
  }
  func.func @transform_3(%arg0: i32) -> (i32, i32) {
    %c0_i32 = arith.constant 0 : i32
    %c0_i32_0 = arith.constant 0 : i32
    %c0_i32_1 = arith.constant 0 : i32
    return %c0_i32, %c0_i32_0 : i32, i32
  }
  func.func @transform_4(%arg0: i32) -> (i32, i32) {
    %c0_i32 = arith.constant 0 : i32
    %c0_i32_0 = arith.constant 0 : i32
    %c0_i32_1 = arith.constant 0 : i32
    return %c0_i32, %c0_i32_0 : i32, i32
  }
  func.func @transform_5(%arg0: i32) -> (i32, i32) {
    %c0_i32 = arith.constant 0 : i32
    %c0_i32_0 = arith.constant 0 : i32
    %c0_i32_1 = arith.constant 0 : i32
    return %c0_i32, %c0_i32_0 : i32, i32
  }
  func.func @transform_6(%arg0: i32) -> (i32, i32) {
    %c0_i32 = arith.constant 0 : i32
    %c0_i32_0 = arith.constant 0 : i32
    %c0_i32_1 = arith.constant 0 : i32
    return %c0_i32, %c0_i32_0 : i32, i32
  }
  func.func @transform_7(%arg0: i32) -> (i32, i32) {
    %c0_i32 = arith.constant 0 : i32
    %c0_i32_0 = arith.constant 0 : i32
    return %arg0, %c0_i32 : i32, i32
  }
}

</mosaic_0001>

<bundles_post_ra>
// kernel: tpu_custom_call.1
= control target key start
LH: loop header
LB: loop body
LE: loop exit
PB: predicated region body
PF: predicated region fallthrough
CT: control target
= control target key end

     0   :  { %12 = vsyncpa [#allocation3], 0  ;;  %s731_s0 = inlined_call_operand.vmem [shape: f32[8,1], index: 0, kind: input, shape index: {}]   ;;  %s732_s1 = inlined_call_operand.vmem [shape: f32[1,32], index: 1, kind: input, shape index: {}]   ;;  %s733_s2 = inlined_call_operand.vmem [shape: f32[1,32], index: 2, kind: input, shape index: {}]   ;;  %s734_s3 = inlined_call_operand.hbm [shape: f32[32,128], index: 3, kind: input, shape index: {}]   ;;  %s735_s4 = inlined_call_operand.vmem [shape: f32[1,128], index: 4, kind: input, shape index: {}]   ;;  %s736_s5 = inlined_call_operand.hbm [shape: f32[128,128], index: 5, kind: input, shape index: {}]   ;;  %s737_s6 = inlined_call_operand.vmem [shape: f32[1,128], index: 6, kind: input, shape index: {}]   ;;  %s738_s7 = inlined_call_operand.hbm [shape: f32[8,128], index: 7, kind: output, shape index: {}]  }
   0x1   :  { %13 = vsyncpa [#allocation6], 0 }
   0x2   :  { %14 = vsyncpa [#allocation4], 0  ;;  %s594_s24 = smov [#allocation2]   ;;  %s522_s28 = scalar_lea.hbm %s734_s3, 512 }
   0x3   :  { %s26_s25 = sshll.u32 %s594_s24, 4  ;;  %p523_p0 = scmp.ne.s32.totalorder %s734_s3, %s522_s28  ;;  %s27_s25 = int_to_ptr.vmem [resolvable:$true] %s26_s25 }
   0x4   :  { %p526_p1 = scmp.lt.u32.totalorder %s522_s28, %s734_s3 }
   0x6   :  { %p528_p2 = pnand %p526_p1, %p523_p0 }
   0x8   :  { %531 = shalt.err (!%p528_p2)
}
   0x9   :  { %s532_s10 = scalar_lea.vmem %s27_s25, 512  ;;  %p537_p4 = scmp.lt.s32.totalorder %s27_s25, %s27_s25 }
   0xa   :  { %p533_p3 = scmp.ne.s32.totalorder %s27_s25, %s532_s10  ;;  %p538_p5 = scmp.lt.s32.totalorder %s532_s10, %s532_s10 }
   0xc   :  { %p539_p6 = por %p538_p5, %p537_p4 }
   0xe   :  { %p540_p7 = pnand %p539_p6, %p533_p3 }
  0x10   :  { %543 = shalt.err (!%p540_p7)
}
  0x11   :  { %s595_s11 = smov 128   ;;  %s596_s12 = smov 8  }
  0x12   :  { %32 = dma.hbm_to_vmem [thread:$0]  %s734_s3, 512, %s27_s25, [#allocation3], %s595_s11, %s595_s11, %s596_s12  }
  0x13   :  { %s597_s15 = smov [#allocation5]   ;;  %s544_s19 = scalar_lea.hbm %s736_s5, 2048 }
  0x14   :  { %s40_s16 = sshll.u32 %s597_s15, 4  ;;  %p545_p8 = scmp.ne.s32.totalorder %s736_s5, %s544_s19  ;;  %s41_s16 = int_to_ptr.vmem [resolvable:$true] %s40_s16 }
  0x15   :  { %p548_p9 = scmp.lt.u32.totalorder %s544_s19, %s736_s5 }
  0x17   :  { %p550_p10 = pnand %p548_p9, %p545_p8 }
  0x19   :  { %553 = shalt.err (!%p550_p10)
}
  0x1a   :  { %s554_s24 = scalar_lea.vmem %s41_s16, 2048  ;;  %p559_p12 = scmp.lt.s32.totalorder %s41_s16, %s41_s16 }
  0x1b   :  { %p555_p11 = scmp.ne.s32.totalorder %s41_s16, %s554_s24  ;;  %p560_p13 = scmp.lt.s32.totalorder %s554_s24, %s554_s24 }
  0x1d   :  { %p561_p0 = por %p560_p13, %p559_p12 }
  0x1f   :  { %p562_p1 = pnand %p561_p0, %p555_p11 }
  0x21   :  { %565 = shalt.err (!%p562_p1)
}
  0x22   :  { %46 = dma.hbm_to_vmem [thread:$0]  %s736_s5, 2048, %s41_s16, [#allocation6], %s595_s11, %s595_s11, %s596_s12  }
  0x23   :  { %588 = dma.done.wait [#allocation3], 512  }
  0x24   :  { %589 = vsyncadd [#allocation3], 4294966784 }
  0x25   :  { %590 = dma.done.wait [#allocation6], 2048  }
  0x26   :  { %591 = vsyncadd [#allocation6], 4294965248  ;;  %v598_v0 = vmov 0   ;;  %v55_v1 = vld [vmem:[%s731_s0] sm:$0xff]  ;;  %v182_v3 = vld [vmem:[#allocation2 + $0x8] sm:$0xff]  ;;  %v599_v5 = vmov 0.0|0.0  }
  0x27   :  { %513 = vset.pattern.permute.xlu0 %v598_v0  ;;  %v181_v2 = vld [vmem:[#allocation2] sm:$0xff]  ;;  %v183_v4 = vld [vmem:[#allocation2 + $0x10] sm:$0xff]  ;;  %464 = vmatprep.subr.bf16.mxu0 %v599_v5  ;;  %v184_v7 = vld [vmem:[#allocation2 + $0x18] sm:$0xff]  ;;  %vm600_vm0 = vmmov 0   ;;  %v601_v8 = vmov 0.0   ;;  %vm192_vm13 = vcmask 261120  }
  0x28   :  { %59 = vperm.xlu0 %513, %v55_v1   ;;  %v465_v6 = vpack.c.bf16 %v182_v3, %v181_v2  ;;  %426 = vmatprep.mubr.msk.f32.mxu0 %vm600_vm0, %v601_v8  ;;  %v468_v9 = vpack.c.bf16 %v184_v7, %v183_v4  ;;  %v387_v10 = vld [vmem:[%s732_s1] ss:$0 sm:$0xff]  ;;  %v602_v26 = vmov 2102212464   ;;  %v603_v28 = vmov 920167782  }
  0x29   :  { %470 = vmatprep.subr.bf16.mxu1 %v599_v5  ;;  %461 = vmatprep.mubr.msk.f32.mxu1 %vm600_vm0, %v601_v8  ;;  %v388_v11 = vld [vmem:[%s733_s2] ss:$0 sm:$0xff]  ;;  %v604_v32 = vmov 1326507024   ;;  %v605_v34 = vmov 683565275  }
  0x2a   :  { %466 = vmatpush3.bf16.msra.mxu0 %v465_v6  ;;  %v606_v36 = vmov 2475754826   ;;  %v607_v39 = vmov 2131351028  }
  0x2b   :  { %467 = vmatprep.subr.bf16.mxu0 %v599_v5 }
  0x2e   :  { %469 = vmatpush3.bf16.msra.mxu0 %v468_v9 }
  0xa7   :  { %v60_v12 = vpop.permute.xlu0 %59 }
  0xa8   :  { %v68_v13 = vmul.f32 %v387_v10, %v60_v12 }
  0xaa   :  { %v685_v14 = vadd.f32 %v388_v11, %v68_v13 }
  0xac   :  { %v80_v15 = vand.u32 2139095040, %v685_v14  ;;  %v77_v16 = vand.u32 2147483647, %v685_v14  ;;  %vm79_vm8 = vcmp.lt.s32.totalorder %v685_v14, 0  ;;  %vm169_vm14 = vweird.f32 %v685_v14 }
  0xae   :  { %v81_v17 = vshrl.u32 %v80_v15, 23  ;;  %v84_v19 = vand.u32 8388607, %v77_v16  ;;  %vm78_vm9 = vcmp.le.f32.partialorder %v77_v16, 0.7853982 }
  0xb0   :  { %v389_v18 = vadd.s32 4294967169, %v81_v17  ;;  %v85_v22 = vor.u32 8388608, %v84_v19 }
  0xb2   :  { %v87_v20 = vadd.s32 1, %v389_v18  ;;  %v125_v30 = vshll.u32 %v85_v22, 8 }
  0xb4   :  { %vm88_vm1 = vcmp.gt.s32.totalorder %v87_v20, 0 }
  0xb5   :  { %v89_v21 = vsel %vm88_vm1, %v87_v20, 0 }
  0xb6   :  { %v91_v23 = vand.u32 31, %v89_v21  ;;  %v90_v24 = vshrl.u32 %v89_v21, 5 }
  0xb8   :  { %v92_v25 = vsub.s32 32, %v91_v23  ;;  %v103_v27 = vshll.u32 %v602_v26, %v91_v23  ;;  %v106_v29 = vshll.u32 %v603_v28, %v91_v23  ;;  %v94_v35 = vshll.u32 %v605_v34, %v91_v23 }
  0xb9   :  { %v97_v38 = vshll.u32 %v606_v36, %v91_v23  ;;  %v100_v41 = vshll.u32 %v607_v39, %v91_v23  ;;  %vm112_vm2 = vcmp.lt.s32.totalorder %v90_v24, 4  ;;  %vm109_vm3 = vcmp.lt.s32.totalorder %v90_v24, 1 }
  0xba   :  { %v104_v31 = vshrl.u32 %v603_v28, %v92_v25  ;;  %v107_v33 = vshrl.u32 %v604_v32, %v92_v25  ;;  %v95_v37 = vshrl.u32 %v606_v36, %v92_v25  ;;  %v98_v40 = vshrl.u32 %v607_v39, %v92_v25 }
  0xbb   :  { %v101_v42 = vshrl.u32 %v602_v26, %v92_v25  ;;  %v93_v46 = vshrl.u32 %v605_v34, %v92_v25  ;;  %vm110_vm4 = vcmp.lt.s32.totalorder %v90_v24, 2  ;;  %vm111_vm5 = vcmp.lt.s32.totalorder %v90_v24, 3 }
  0xbc   :  { %v105_v43 = vor.u32 %v104_v31, %v103_v27  ;;  %v108_v44 = vor.u32 %v107_v33, %v106_v29  ;;  %v96_v45 = vor.u32 %v95_v37, %v94_v35  ;;  %v99_v47 = vor.u32 %v98_v40, %v97_v38 }
  0xbd   :  { %v102_v48 = vor.u32 %v101_v42, %v100_v41 }
  0xbe   :  { %v118_v49 = vsel %vm112_vm2, %v105_v43, 920167782  ;;  %v122_v50 = vsel %vm112_vm2, %v108_v44, 1326507024  ;;  %v117_v52 = vsel %vm109_vm3, %v96_v45, %v99_v47  ;;  %v113_v55 = vsel %vm109_vm3, %v93_v46, %v96_v45  ;;  %v277_v44 = vld [vmem:[#allocation5] sm:$0xff]  ;;  %v278_v45 = vld [vmem:[#allocation5 + $0x8] sm:$0xff] }
  0xbf   :  { %v114_v51 = vsel %vm112_vm2, %v102_v48, 2102212464  ;;  %v119_v53 = vsel %vm111_vm5, %v102_v48, %v118_v49  ;;  %v121_v54 = vsel %vm109_vm3, %v99_v47, %v102_v48  ;;  %v123_v58 = vsel %vm111_vm5, %v105_v43, %v122_v50  ;;  %v279_v46 = vld [vmem:[#allocation5 + $0x10] sm:$0xff]  ;;  %v280_v48 = vld [vmem:[#allocation5 + $0x18] sm:$0xff]  ;;  %v281_v50 = vld [vmem:[#allocation5 + $0x20] sm:$0xff] }
  0xc0   :  { %v115_v56 = vsel %vm111_vm5, %v99_v47, %v114_v51  ;;  %v120_v57 = vsel %vm110_vm4, %v117_v52, %v119_v53  ;;  %v124_v59 = vsel %vm110_vm4, %v121_v54, %v123_v58  ;;  %v471_v47 = vpack.c.bf16 %v278_v45, %v277_v44  ;;  %v282_v51 = vld [vmem:[#allocation5 + $0x28] sm:$0xff]  ;;  %v283_v53 = vld [vmem:[#allocation5 + $0x30] sm:$0xff] }
  0xc1   :  { %v691_v60 = vmul.u32.u64.low %v125_v30, %v120_v57  ;;  %v692_v61 = vmul.u32.u64.high %v125_v30, %v120_v57, %v691_v60  ;;  %v694_v62 = vmul.u32.u64.low %v125_v30, %v124_v59  ;;  %v695_v63 = vmul.u32.u64.high %v125_v30, %v124_v59, %v694_v62  ;;  %v287_v58 = vld [vmem:[#allocation5 + $0x50] sm:$0xff]  ;;  %v288_v59 = vld [vmem:[#allocation5 + $0x58] sm:$0xff] }
  0xc2   :  { %v116_v0 = vsel %vm110_vm4, %v113_v55, %v115_v56  ;;  %472 = vmatpush3.bf16.msra.mxu1 %v471_v47  ;;  %v474_v49 = vpack.c.bf16 %v280_v48, %v279_v46  ;;  %v477_v52 = vpack.c.bf16 %v282_v51, %v281_v50  ;;  %v285_v55 = vld [vmem:[#allocation5 + $0x40] sm:$0xff]  ;;  %v286_v56 = vld [vmem:[#allocation5 + $0x48] sm:$0xff] }
  0xc3   :  { %v135_v1 = vadd.s32 1, %v692_v61  ;;  %v132_v2 = vmul.u32 %v125_v30, %v116_v0  ;;  %vm134_vm6 = vc.u32 %v695_v63, %v691_v60  ;;  %v133_v17 = vadd.s32 %v691_v60, %v695_v63  ;;  %473 = vmatprep.subr.bf16.mxu1 %v599_v5  ;;  %v290_v62 = vld [vmem:[#allocation5 + $0x68] sm:$0xff]  ;;  %v291_v0 = vld [vmem:[#allocation5 + $0x70] sm:$0xff] }
  0xc4   :  { %v483_v57 = vpack.c.bf16 %v286_v56, %v285_v55  ;;  %v486_v60 = vpack.c.bf16 %v288_v59, %v287_v58 }
  0xc5   :  { %v136_v3 = vsel %vm134_vm6, %v135_v1, %v692_v61  ;;  %v289_v61 = vld [vmem:[#allocation5 + $0x60] sm:$0xff]  ;;  %v292_v1 = vld [vmem:[#allocation5 + $0x78] sm:$0xff] }
  0xc6   :  { %v137_v4 = vadd.s32 %v136_v3, %v132_v2  ;;  %475 = vmatpush3.bf16.msra.mxu1 %v474_v49  ;;  %v489_v63 = vpack.c.bf16 %v290_v62, %v289_v61  ;;  %v492_v2 = vpack.c.bf16 %v292_v1, %v291_v0  ;;  %v393_v3 = vld [vmem:[%s735_s4] ss:$0 sm:$0xff]  ;;  %s608_s4 = smov [#allocation7]  }
  0xc7   :  { %476 = vmatprep.subr.bf16.mxu1 %v599_v5  ;;  %s377_s9 = sshll.u32 %s608_s4, 4  ;;  %s378_s9 = int_to_ptr.vmem [resolvable:$true] %s377_s9 }
  0xc8   :  { %v138_v6 = vadd.s32 536870912, %v137_v4  ;;  %s566_s10 = scalar_lea.vmem %s378_s9, 128  ;;  %p571_p3 = scmp.lt.s32.totalorder %s378_s9, %s378_s9 }
  0xc9   :  { %p567_p2 = scmp.ne.s32.totalorder %s378_s9, %s566_s10  ;;  %p572_p4 = scmp.lt.s32.totalorder %s566_s10, %s566_s10 }
  0xca   :  { %v139_v7 = vshrl.u32 %v138_v6, 30  ;;  %478 = vmatpush3.bf16.msra.mxu1 %v477_v52 }
  0xcb   :  { %479 = vmatprep.subr.bf16.mxu1 %v599_v5  ;;  %p573_p5 = por %p572_p4, %p571_p3 }
  0xcc   :  { %v140_v8 = vshll.u32 %v139_v7, 30  ;;  %v163_v29 = vsub.s32 4, %v139_v7 }
  0xcd   :  { %p574_p6 = pnand %p573_p5, %p567_p2 }
  0xce   :  { %v141_v9 = vsub.s32 %v137_v4, %v140_v8  ;;  %v164_v32 = vsel %vm79_vm8, %v163_v29, %v139_v7 }
  0xcf   :  { %v166_v34 = vsel %vm78_vm9, 0, %v164_v32 }
  0xd0   :  { %v143_v10 = vsub.s32 0, %v141_v9  ;;  %v170_v35 = vadd.s32 3, %v166_v34 }
  0xd2   :  { %v390_v11 = vmin.u32 %v143_v10, %v141_v9  ;;  %v171_v36 = vand.u32 3, %v170_v35 }
  0xd4   :  { %v145_v12 = vclz %v390_v11  ;;  %vm176_vm10 = vcmp.eq.s32.totalorder %v171_v36, 2  ;;  %vm173_vm11 = vcmp.eq.s32.totalorder %v171_v36, 0  ;;  %vm172_vm12 = vcmp.lt.s32.totalorder %v171_v36, 2 }
  0xd6   :  { %v391_v13 = vadd.s32 4294967294, %v145_v12 }
  0xd8   :  { %vm392_vm7 = vcmp.lt.s32.totalorder %v391_v13, 0 }
  0xd9   :  { %v148_v15 = vsel %vm392_vm7, 0, %v391_v13 }
  0xda   :  { %v149_v18 = vsub.s32 32, %v148_v15  ;;  %v153_v19 = vsub.s32 4294967266, %v148_v15  ;;  %v150_v20 = vshll.u32 %v141_v9, %v148_v15 }
  0xdc   :  { %v151_v21 = vshrl.u32 %v133_v17, %v149_v18  ;;  %v154_v22 = vadd.s32 127, %v153_v19  ;;  %v395_v19 = vld [vmem:[%s737_s6] ss:$0 sm:$0xff] }
  0xde   :  { %v152_v23 = vor.u32 %v151_v21, %v150_v20  ;;  %v155_v24 = vshll.u32 %v154_v22, 23 }
  0xe0   :  { %v156_v25 = vor.u32 4788187, %v155_v24  ;;  %v159_v27 = vcvt.s32.f32 %v152_v23 }
  0xe2   :  { %v157_v26 = vand.u32 2147483647, %v156_v25 }
  0xe4   :  { %v160_v28 = vmul.f32 %v159_v27, %v157_v26 }
  0xe6   :  { %v161_v30 = vxor.u32 2147483648, %v160_v28 }
  0xe8   :  { %v162_v31 = vsel %vm79_vm8, %v161_v30, %v160_v28 }
  0xe9   :  { %v165_v33 = vsel %vm78_vm9, %v685_v14, %v162_v31  ;;  %v284_v14 = vld [vmem:[#allocation5 + $0x38] sm:$0xff] }
  0xea   :  { %514 = vcosq.f32 %v165_v33  ;;  %v480_v54 = vpack.c.bf16 %v284_v14, %v283_v53 }
  0xeb   :  { %516 = vsinq.f32 %v165_v33 }
  0xec   :  { %481 = vmatpush3.bf16.msra.mxu1 %v480_v54 }
  0xed   :  { %482 = vmatprep.subr.bf16.mxu1 %v599_v5 }
  0xf0   :  { %484 = vmatpush3.bf16.msra.mxu1 %v483_v57 }
  0xf1   :  { %485 = vmatprep.subr.bf16.mxu1 %v599_v5 }
  0xf4   :  { %v515_v37 = vpop.eup %514  ;;  %487 = vmatpush3.bf16.msra.mxu1 %v486_v60 }
  0xf5   :  { %v517_v38 = vpop.eup %516  ;;  %v177_v39 = vxor.u32 2147483648, %v515_v37  ;;  %488 = vmatprep.subr.bf16.mxu1 %v599_v5 }
  0xf6   :  { %v174_v40 = vxor.u32 2147483648, %v517_v38 }
  0xf7   :  { %v178_v41 = vsel %vm176_vm10, %v177_v39, %v517_v38 }
  0xf8   :  { %v175_v42 = vsel %vm173_vm11, %v515_v37, %v174_v40  ;;  %490 = vmatpush3.bf16.msra.mxu1 %v489_v63 }
  0xf9   :  { %v179_v16 = vsel %vm172_vm12, %v175_v42, %v178_v41  ;;  %491 = vmatprep.subr.bf16.mxu1 %v599_v5 }
  0xfa   :  { %v180_v43 = vsel %vm169_vm14, nan, %v179_v16 }
  0xfb   :  { %427 = vmatmul.mubr.msk.f32.vlgmr.msra.gmra.mrb[0].mxu0 %vm192_vm13, %v180_v43 }
  0xfc   :  { %493 = vmatpush3.bf16.msra.mxu1 %v492_v2 }
 0x1ce   :  { %v262_v4 = vpop.f32.mrb[0].mxu0 }
 0x1cf   :  { %v263_v6 = vadd.f32 %v393_v3, %v262_v4  ;;  %v428_v7 = vpop.f32.mrb[1].mxu0 }
 0x1d1   :  { %v266_v8 = vmin.f32 %v263_v6, 20.0  ;;  %vm275_vm15 = vcmp.gt.f32.partialorder %v263_v6, 20.0 }
 0x1d3   :  { %v267_v9 = vmul.f32 1.442695, %v266_v8 }
 0x1d5   :  { %518 = vpow2.f32 %v267_v9 }
 0x1df   :  { %v519_v10 = vpop.eup %518 }
 0x1e0   :  { %v269_v11 = vadd.f32 2.0, %v519_v10 }
 0x1e2   :  { %v270_v12 = vmul.f32 %v519_v10, %v269_v11 }
 0x1e4   :  { %v271_v13 = vadd.f32 2.0, %v270_v12 }
 0x1e6   :  { %520 = vrcp.f32 %v271_v13 }
 0x1f0   :  { %v521_v15 = vpop.eup %520 }
 0x1f1   :  { %v273_v17 = vmul.f32 %v521_v15, %v270_v12 }
 0x1f3   :  { %v274_v18 = vmul.f32 %v273_v17, %v263_v6 }
 0x1f5   :  { %v276_v5 = vsel %vm275_vm15, %v263_v6, %v274_v18 }
 0x1f6   :  { %462 = vmatmul.mubr.f32.vlgmr.msra.gmra.mrb[0].mxu1 %v276_v5 }
 0x2c9   :  { %v366_v20 = vpop.f32.mrb[0].mxu1 }
 0x2ca   :  { %v367_v21 = vadd.f32 %v395_v19, %v366_v20  ;;  %v463_v22 = vpop.f32.mrb[1].mxu1 }
 0x2cc   :  { %370 = vst [vmem:[#allocation7] sm:$0xff] %v367_v21 }
 0x2cd   :  { %577 = shalt.err (!%p574_p6)
}
 0x2ce   :  { %s578_s13 = scalar_lea.hbm %s738_s7, 128 }
 0x2cf   :  { %p579_p7 = scmp.ne.s32.totalorder %s738_s7, %s578_s13  ;;  %p582_p8 = scmp.lt.u32.totalorder %s578_s13, %s738_s7 }
 0x2d1   :  { %p584_p9 = pnand %p582_p8, %p579_p7 }
 0x2d3   :  { %587 = shalt.err (!%p584_p9)
}
 0x2d4   :  { %380 = dma.vmem_to_hbm [thread:$0]  %s378_s9, 128, %s738_s7, [#allocation4]  }
 0x2d5   :  { %592 = dma.done.wait [#allocation4], 128  }
 0x2d6   :  { %593 = vsyncadd [#allocation4], 4294967168 }
 0x2d7   :  { %384 = vsyncpa [#allocation3], 1 }
 0x2d8   :  { %385 = vsyncpa [#allocation6], 1 }
 0x2d9   :  { %386 = vsyncpa [#allocation4], 1 }

</bundles_post_ra>
